<compile_context>
chip_gen: v5e
topology: v5e:2x2
jax: 0.10.0
libtpu: 0.0.40
codegen_flags: <defaults>
</compile_context>

<pallas_src>
import functools

import jax
import jax.numpy as jnp
from jax.experimental import pallas as pl
from jax.experimental.pallas import tpu as pltpu

D_IN = 512
D_HID = 256
BN_EPS = 1e-5


def _round_up(x, m):
    return ((x + m - 1) // m) * m


def _hidden_kernel(x1_ref, x2_ref, w1_ref, b1_ref, h_ref, sum_ref, ssq_ref,
                   *, tile_b, b_actual):
    # f32 elementwise abs-diff (preserves tiny differences for near-identical
    # siamese pairs); only the MXU operand is cast to bf16, accumulation is f32.
    x = jnp.abs(x1_ref[...] - x2_ref[...])                        # (tile_b, 512) f32
    h = jnp.dot(x.astype(jnp.bfloat16), w1_ref[...],
                preferred_element_type=jnp.float32)
    h = jnp.maximum(h + b1_ref[...], 0.0)                         # (tile_b, 256) f32
    h_ref[...] = h.astype(jnp.bfloat16)                           # bf16 to HBM

    # Per-tile partial BatchNorm statistics (f32).  Mask ragged-tail rows (the
    # clipped boundary block contains garbage there) so they never contaminate
    # the full-batch mean / variance.
    if b_actual % tile_b != 0:
        row = (pl.program_id(0) * tile_b
               + jax.lax.broadcasted_iota(jnp.int32, (tile_b, 1), 0))
        h = jnp.where(row < b_actual, h, 0.0)
    sum_ref[...] = jnp.sum(h, axis=0, keepdims=True)[None]        # (1, 1, 256)
    ssq_ref[...] = jnp.sum(h * h, axis=0, keepdims=True)[None]    # (1, 1, 256)


def _out_kernel(h_ref, coef_ref, offs_ref, o_ref):
    # (1,256)_bf16 . (tile_b,256)_bf16^T -> (1, tile_b): lane-dense logits, MXU.
    z = jax.lax.dot_general(
        coef_ref[...], h_ref[...],
        dimension_numbers=(((1,), (1,)), ((), ())),
        preferred_element_type=jnp.float32)
    o_ref[...] = jax.nn.sigmoid(z + offs_ref[0])[None]            # (1, 1, tile_b)


@functools.partial(jax.jit, static_argnames=("tile_b",))
def siamese_forward(x1, x2, params, tile_b=2048):
    """x1, x2: (..., 512) float32.  Returns (B, 1) float32, B = prod(leading dims)."""
    w1, b1, gamma, beta, w2, b2 = params

    x1 = x1.reshape(-1, D_IN).astype(jnp.float32)
    x2 = x2.reshape(-1, D_IN).astype(jnp.float32)
    B = x1.shape[0]

    # Clamp the batch tile to the (8-rounded) batch for tiny demos; for batches
    # big enough to split, cap it so there are >= 2 grid steps (v7x has two
    # TensorCores sharing the "parallel" batch axis).
    tile_b = max(8, min(tile_b, _round_up(B, 8)))
    if B >= 512:
        tile_b = min(tile_b, _round_up(pl.cdiv(B, 2), 256))
    num_tiles = pl.cdiv(B, tile_b)

    # W1 is tiny (256 KiB in bf16) and resident across the batch loop.
    w1_bf = w1.astype(jnp.bfloat16)

    hidden_kernel = functools.partial(_hidden_kernel, tile_b=tile_b, b_actual=B)
    h, psum, pssq = pl.pallas_call(
        hidden_kernel,
        out_shape=(jax.ShapeDtypeStruct((B, D_HID), jnp.bfloat16),
                   jax.ShapeDtypeStruct((num_tiles, 1, D_HID), jnp.float32),
                   jax.ShapeDtypeStruct((num_tiles, 1, D_HID), jnp.float32)),
        grid_spec=pltpu.PrefetchScalarGridSpec(
            num_scalar_prefetch=0,
            grid=(num_tiles,),
            in_specs=[
                pl.BlockSpec((tile_b, D_IN), lambda i: (i, 0)),     # x1 tile (f32)
                pl.BlockSpec((tile_b, D_IN), lambda i: (i, 0)),     # x2 tile (f32)
                pl.BlockSpec((D_IN, D_HID), lambda i: (0, 0)),      # W1 (resident)
                pl.BlockSpec((1, D_HID), lambda i: (0, 0)),         # b1 (resident)
            ],
            out_specs=(
                pl.BlockSpec((tile_b, D_HID), lambda i: (i, 0)),    # h tile (bf16)
                pl.BlockSpec((1, 1, D_HID), lambda i: (i, 0, 0)),   # partial sum
                pl.BlockSpec((1, 1, D_HID), lambda i: (i, 0, 0)),   # partial sumsq
            )),
        compiler_params=pltpu.CompilerParams(
            dimension_semantics=("parallel",),
            vmem_limit_bytes=40 << 20),
    )(x1, x2, w1_bf, b1)

    # Full-batch statistics (training-mode BN: biased variance), in f32.
    mean = jnp.sum(psum[:, 0, :], axis=0) / B
    var = jnp.maximum(jnp.sum(pssq[:, 0, :], axis=0) / B - mean * mean, 0.0)
    inv_std = jax.lax.rsqrt(var + BN_EPS)

    # Fold BN affine + Linear(256, 1):
    #   logit = sum(h * coef) - sum(mean * coef) + sum(beta * w2) + b2
    gw2 = gamma.reshape(-1) * w2.reshape(-1)
    coef = (inv_std * gw2).reshape(1, D_HID)
    coef_bf = coef.astype(jnp.bfloat16)                 # matches bf16 h on the MXU
    coef_rt = coef_bf.astype(jnp.float32)               # bf16-rounded, for the offset
    offset = (jnp.sum(beta.reshape(-1) * w2.reshape(-1))
              - jnp.sum(mean * coef_rt.reshape(-1))
              + b2.reshape(()))
    offset = offset.reshape(1).astype(jnp.float32)

    out_slab = pl.pallas_call(
        _out_kernel,
        out_shape=jax.ShapeDtypeStruct((num_tiles, 1, tile_b), jnp.float32),
        grid_spec=pltpu.PrefetchScalarGridSpec(
            num_scalar_prefetch=0,
            grid=(num_tiles,),
            in_specs=[
                pl.BlockSpec((tile_b, D_HID), lambda i: (i, 0)),            # h tile
                pl.BlockSpec((1, D_HID), lambda i: (0, 0)),                 # coef (resident)
                pl.BlockSpec(memory_space=pltpu.MemorySpace.SMEM),          # scalar offset
            ],
            out_specs=pl.BlockSpec((1, 1, tile_b), lambda i: (i, 0, 0))),   # lane-dense slab
        compiler_params=pltpu.CompilerParams(
            dimension_semantics=("parallel",),
            vmem_limit_bytes=40 << 20),
    )(h, coef_bf, offset)

    return out_slab.reshape(num_tiles * tile_b, 1)[:B]


def siamese_reference(x1, x2, params):
    """Pure-JAX f32 reference with the same semantics (for validation)."""
    w1, b1, gamma, beta, w2, b2 = params
    x = jnp.abs(x1.reshape(-1, D_IN) - x2.reshape(-1, D_IN))
    h = jnp.maximum(x @ w1 + b1, 0.0)
    mean = jnp.mean(h, axis=0, keepdims=True)
    var = jnp.mean((h - mean) ** 2, axis=0, keepdims=True)
    h = (h - mean) * jax.lax.rsqrt(var + BN_EPS) * gamma + beta
    return jax.nn.sigmoid(h @ w2.T + b2)


def init_params(key):
    """PyTorch-default-style init: Linear U[-1/sqrt(fan_in), +], BN gamma=1, beta=0."""
    k1, k2, k3, k4 = jax.random.split(key, 4)
    bound1 = 1.0 / jnp.sqrt(jnp.float32(D_IN))
    bound2 = 1.0 / jnp.sqrt(jnp.float32(D_HID))
    w1 = jax.random.uniform(k1, (D_IN, D_HID), jnp.float32, -bound1, bound1)
    b1 = jax.random.uniform(k2, (1, D_HID), jnp.float32, -bound1, bound1)
    gamma = jnp.ones((1, D_HID), jnp.float32)
    beta = jnp.zeros((1, D_HID), jnp.float32)
    w2 = jax.random.uniform(k3, (1, D_HID), jnp.float32, -bound2, bound2)
    b2 = jax.random.uniform(k4, (1, 1), jnp.float32, -bound2, bound2)
    return (w1, b1, gamma, beta, w2, b2)


if __name__ == "__main__":
    key = jax.random.PRNGKey(0)
    kp, kx1, kx2, kx3, kx4 = jax.random.split(key, 5)
    params = init_params(kp)

    # Primary small example (single tile, divisible batch).
    B = 8
    x1 = jax.random.normal(kx1, (B, D_IN), jnp.float32)
    x2 = jax.random.normal(kx2, (B, D_IN), jnp.float32)
    out = siamese_forward(x1, x2, params)
    jax.block_until_ready(out)
    assert out.shape == (B, 1) and out.dtype == jnp.float32
    ref = siamese_reference(x1, x2, params)
    assert float(jnp.max(jnp.abs(out - ref))) < 2e-2  # bf16-MXU tolerance

    # Secondary example: multi-tile grid, ragged tail (boundary clipping + BN mask).
    B2 = 20
    y1 = jax.random.normal(kx3, (B2, D_IN), jnp.float32)
    y2 = jax.random.normal(kx4, (B2, D_IN), jnp.float32)
    out2 = siamese_forward(y1, y2, params, tile_b=16)
    jax.block_until_ready(out2)
    assert out2.shape == (B2, 1)
    ref2 = siamese_reference(y1, y2, params)
    assert float(jnp.max(jnp.abs(out2 - ref2))) < 2e-2

    print("KERNEL_OK")
</pallas_src>

<mosaic_0001>
module attributes {stable_mosaic.version = 11 : i64} {
  func.func @_out_kernel(%arg0: i32, %arg1: memref<8x256xbf16, #tpu.memory_space<vmem>>, %arg2: memref<1x256xbf16, #tpu.memory_space<vmem>>, %arg3: memref<1xf32, #tpu.memory_space<smem>>, %arg4: memref<1x1x8xf32, #tpu.memory_space<vmem>>) attributes {dimension_semantics = [#tpu.dimension_semantics<parallel>], iteration_bounds = array<i64: 1>, scalar_prefetch = 0 : i64, scratch_operands = 0 : i64, tpu.core_type = #tpu.core_type<tc>, window_params = [{transform_indices = @transform_0, window_bounds = array<i64: 8, 256>}, {pipeline_mode = #tpu.pipeline_mode<synchronous>, transform_indices = @transform_1, window_bounds = array<i64: 1, 256>}, {transform_indices = @transform_2, window_bounds = array<i64: 1>}, {transform_indices = @transform_3, window_bounds = array<i64: 1, 1, 8>}]} {
    %c0 = arith.constant 0 : index
    %c0_0 = arith.constant 0 : index
    %0 = vector.load %arg2[%c0, %c0_0] : memref<1x256xbf16, #tpu.memory_space<vmem>>, vector<1x256xbf16>
    %c0_1 = arith.constant 0 : index
    %c0_2 = arith.constant 0 : index
    %1 = vector.load %arg1[%c0_1, %c0_2] : memref<8x256xbf16, #tpu.memory_space<vmem>>, vector<8x256xbf16>
    %cst = arith.constant dense<0.000000e+00> : vector<1x8xf32>
    %2 = tpu.matmul %0, %1, %cst {dimension_numbers = #tpu.dot_dimension_numbers<[1], [1], [0], [0], [0, 0, 1, 0], [], []>} : vector<1x256xbf16>, vector<8x256xbf16>, vector<1x8xf32> -> vector<1x8xf32>
    %c0_3 = arith.constant 0 : index
    %3 = memref.load %arg3[%c0_3] : memref<1xf32, #tpu.memory_space<smem>>
    %4 = vector.broadcast %3 : f32 to vector<1x8xf32>
    %5 = arith.addf %2, %4 : vector<1x8xf32>
    %6 = arith.negf %5 : vector<1x8xf32>
    %7 = math.exp %6 : vector<1x8xf32>
    %cst_4 = arith.constant 1.000000e+00 : f32
    %8 = vector.broadcast %cst_4 : f32 to vector<1x8xf32>
    %9 = arith.addf %8, %7 : vector<1x8xf32>
    %10 = arith.divf %8, %9 : vector<1x8xf32>
    %11 = vector.shape_cast %10 : vector<1x8xf32> to vector<1x1x8xf32>
    %c0_5 = arith.constant 0 : index
    %c0_6 = arith.constant 0 : index
    %c0_7 = arith.constant 0 : index
    %12 = vector.load %arg4[%c0_5, %c0_6, %c0_7] : memref<1x1x8xf32, #tpu.memory_space<vmem>>, vector<1x1x8xf32>
    tpu.vector_store %arg4[%c0_5, %c0_6, %c0_7], %11 {strides = array<i32>} : memref<1x1x8xf32, #tpu.memory_space<vmem>>, vector<1x1x8xf32>,
    return
  }
  func.func @transform_0(%arg0: i32) -> (i32, i32) {
    %c0_i32 = arith.constant 0 : i32
    %c0_i32_0 = arith.constant 0 : i32
    return %arg0, %c0_i32 : i32, i32
  }
  func.func @transform_1(%arg0: i32) -> (i32, i32) {
    %c0_i32 = arith.constant 0 : i32
    %c0_i32_0 = arith.constant 0 : i32
    %c0_i32_1 = arith.constant 0 : i32
    return %c0_i32, %c0_i32_0 : i32, i32
  }
  func.func @transform_2(%arg0: i32) -> i32 {
    %c0_i32 = arith.constant 0 : i32
    %c0_i32_0 = arith.constant 0 : i32
    return %c0_i32 : i32
  }
  func.func @transform_3(%arg0: i32) -> (i32, i32, i32) {
    %c0_i32 = arith.constant 0 : i32
    %c0_i32_0 = arith.constant 0 : i32
    %c0_i32_1 = arith.constant 0 : i32
    return %arg0, %c0_i32, %c0_i32_0 : i32, i32, i32
  }
}

module attributes {stable_mosaic.version = 11 : i64} {
  func.func @_hidden_kernel(%arg0: i32, %arg1: memref<8x512xf32, #tpu.memory_space<vmem>>, %arg2: memref<8x512xf32, #tpu.memory_space<vmem>>, %arg3: memref<512x256xbf16, #tpu.memory_space<vmem>>, %arg4: memref<1x256xf32, #tpu.memory_space<vmem>>, %arg5: memref<8x256xbf16, #tpu.memory_space<vmem>>, %arg6: memref<1x1x256xf32, #tpu.memory_space<vmem>>, %arg7: memref<1x1x256xf32, #tpu.memory_space<vmem>>) attributes {dimension_semantics = [#tpu.dimension_semantics<parallel>], iteration_bounds = array<i64: 1>, scalar_prefetch = 0 : i64, scratch_operands = 0 : i64, tpu.core_type = #tpu.core_type<tc>, window_params = [{transform_indices = @transform_0, window_bounds = array<i64: 8, 512>}, {transform_indices = @transform_1, window_bounds = array<i64: 8, 512>}, {pipeline_mode = #tpu.pipeline_mode<synchronous>, transform_indices = @transform_2, window_bounds = array<i64: 512, 256>}, {pipeline_mode = #tpu.pipeline_mode<synchronous>, transform_indices = @transform_3, window_bounds = array<i64: 1, 256>}, {transform_indices = @transform_4, window_bounds = array<i64: 8, 256>}, {transform_indices = @transform_5, window_bounds = array<i64: 1, 1, 256>}, {transform_indices = @transform_6, window_bounds = array<i64: 1, 1, 256>}]} {
    %c0 = arith.constant 0 : index
    %c0_0 = arith.constant 0 : index
    %0 = vector.load %arg1[%c0, %c0_0] : memref<8x512xf32, #tpu.memory_space<vmem>>, vector<8x512xf32>
    %c0_1 = arith.constant 0 : index
    %c0_2 = arith.constant 0 : index
    %1 = vector.load %arg2[%c0_1, %c0_2] : memref<8x512xf32, #tpu.memory_space<vmem>>, vector<8x512xf32>
    %2 = arith.subf %0, %1 : vector<8x512xf32>
    %3 = math.absf %2 : vector<8x512xf32>
    %4 = arith.truncf %3 : vector<8x512xf32> to vector<8x512xbf16>
    %c0_3 = arith.constant 0 : index
    %c0_4 = arith.constant 0 : index
    %5 = vector.load %arg3[%c0_3, %c0_4] : memref<512x256xbf16, #tpu.memory_space<vmem>>, vector<512x256xbf16>
    %cst = arith.constant dense<0.000000e+00> : vector<8x256xf32>
    %6 = tpu.matmul %4, %5, %cst {dimension_numbers = #tpu.dot_dimension_numbers<[1], [0], [0], [1], [0, 0, 1, 1], [], []>} : vector<8x512xbf16>, vector<512x256xbf16>, vector<8x256xf32> -> vector<8x256xf32>
    %c0_5 = arith.constant 0 : index
    %c0_6 = arith.constant 0 : index
    %7 = vector.load %arg4[%c0_5, %c0_6] : memref<1x256xf32, #tpu.memory_space<vmem>>, vector<1x256xf32>
    %8 = vector.broadcast %7 : vector<1x256xf32> to vector<8x256xf32>
    %9 = arith.addf %6, %8 : vector<8x256xf32>
    %cst_7 = arith.constant 0.000000e+00 : f32
    %10 = vector.broadcast %cst_7 : f32 to vector<8x256xf32>
    %11 = arith.maximumf %9, %10 : vector<8x256xf32>
    %12 = arith.truncf %11 : vector<8x256xf32> to vector<8x256xbf16>
    %c0_8 = arith.constant 0 : index
    %c0_9 = arith.constant 0 : index
    %13 = vector.load %arg5[%c0_8, %c0_9] : memref<8x256xbf16, #tpu.memory_space<vmem>>, vector<8x256xbf16>
    tpu.vector_store %arg5[%c0_8, %c0_9], %12 {strides = array<i32>} : memref<8x256xbf16, #tpu.memory_space<vmem>>, vector<8x256xbf16>,
    %cst_10 = arith.constant dense<0.000000e+00> : vector<256xf32>
    %14 = vector.multi_reduction <add>, %11, %cst_10 [0] : vector<8x256xf32> to vector<256xf32>
    %15 = vector.shape_cast %14 : vector<256xf32> to vector<1x256xf32>
    %16 = vector.shape_cast %15 : vector<1x256xf32> to vector<1x1x256xf32>
    %c0_11 = arith.constant 0 : index
    %c0_12 = arith.constant 0 : index
    %c0_13 = arith.constant 0 : index
    %17 = vector.load %arg6[%c0_11, %c0_12, %c0_13] : memref<1x1x256xf32, #tpu.memory_space<vmem>>, vector<1x1x256xf32>
    tpu.vector_store %arg6[%c0_11, %c0_12, %c0_13], %16 {strides = array<i32>} : memref<1x1x256xf32, #tpu.memory_space<vmem>>, vector<1x1x256xf32>,
    %18 = arith.mulf %11, %11 : vector<8x256xf32>
    %cst_14 = arith.constant dense<0.000000e+00> : vector<256xf32>
    %19 = vector.multi_reduction <add>, %18, %cst_14 [0] : vector<8x256xf32> to vector<256xf32>
    %20 = vector.shape_cast %19 : vector<256xf32> to vector<1x256xf32>
    %21 = vector.shape_cast %20 : vector<1x256xf32> to vector<1x1x256xf32>
    %c0_15 = arith.constant 0 : index
    %c0_16 = arith.constant 0 : index
    %c0_17 = arith.constant 0 : index
    %22 = vector.load %arg7[%c0_15, %c0_16, %c0_17] : memref<1x1x256xf32, #tpu.memory_space<vmem>>, vector<1x1x256xf32>
    tpu.vector_store %arg7[%c0_15, %c0_16, %c0_17], %21 {strides = array<i32>} : memref<1x1x256xf32, #tpu.memory_space<vmem>>, vector<1x1x256xf32>,
    return
  }
  func.func @transform_0(%arg0: i32) -> (i32, i32) {
    %c0_i32 = arith.constant 0 : i32
    %c0_i32_0 = arith.constant 0 : i32
    return %arg0, %c0_i32 : i32, i32
  }
  func.func @transform_1(%arg0: i32) -> (i32, i32) {
    %c0_i32 = arith.constant 0 : i32
    %c0_i32_0 = arith.constant 0 : i32
    return %arg0, %c0_i32 : i32, i32
  }
  func.func @transform_2(%arg0: i32) -> (i32, i32) {
    %c0_i32 = arith.constant 0 : i32
    %c0_i32_0 = arith.constant 0 : i32
    %c0_i32_1 = arith.constant 0 : i32
    return %c0_i32, %c0_i32_0 : i32, i32
  }
  func.func @transform_3(%arg0: i32) -> (i32, i32) {
    %c0_i32 = arith.constant 0 : i32
    %c0_i32_0 = arith.constant 0 : i32
    %c0_i32_1 = arith.constant 0 : i32
    return %c0_i32, %c0_i32_0 : i32, i32
  }
  func.func @transform_4(%arg0: i32) -> (i32, i32) {
    %c0_i32 = arith.constant 0 : i32
    %c0_i32_0 = arith.constant 0 : i32
    return %arg0, %c0_i32 : i32, i32
  }
  func.func @transform_5(%arg0: i32) -> (i32, i32, i32) {
    %c0_i32 = arith.constant 0 : i32
    %c0_i32_0 = arith.constant 0 : i32
    %c0_i32_1 = arith.constant 0 : i32
    return %arg0, %c0_i32, %c0_i32_0 : i32, i32, i32
  }
  func.func @transform_6(%arg0: i32) -> (i32, i32, i32) {
    %c0_i32 = arith.constant 0 : i32
    %c0_i32_0 = arith.constant 0 : i32
    %c0_i32_1 = arith.constant 0 : i32
    return %arg0, %c0_i32, %c0_i32_0 : i32, i32, i32
  }
}

</mosaic_0001>

<bundles_post_ra>
// kernel: siamese_forward.3
= control target key start
LH: loop header
LB: loop body
LE: loop exit
PB: predicated region body
PF: predicated region fallthrough
CT: control target
= control target key end

     0   :  { %s162_s0 = inlined_call_operand.vmem [shape: bf16[8,256], index: 0, kind: input, shape index: {}]   ;;  %s163_s1 = inlined_call_operand.vmem [shape: bf16[1,256], index: 1, kind: input, shape index: {}]   ;;  %s164_s2 = inlined_call_operand.<no memory space> [shape: f32[1], index: 2, kind: input, shape index: {}]   ;;  %s165_s3 = inlined_call_operand.hbm [shape: f32[1,1,8], index: 3, kind: output, shape index: {}]  }
   0x1   :  { %v18_v0 = vld [vmem:[%s162_s0] sm:$0xff] }
   0x2   :  { %v17_v1 = vld [vmem:[%s163_s1] sm:$0x3] }
   0x3   :  { %9 = vsyncpa [#allocation4], 0  ;;  %v28_v2 = vunpack.c.l.b16 %v18_v0  ;;  %v29_v3 = vunpack.c.h.b16 %v18_v0  ;;  %22 = vst [vmem:[#allocation1] ss:$9 sm:$0xff] %v17_v1  ;;  %v20_v8 = vstv %s164_s2  ;;  %s129_s0 = smov [#allocation3]   ;;  %s88_s19 = sshll.u32 %s165_s3, 4  ;;  %s89_s19 = int_to_ptr.hbm [resolvable:$true] %s88_s19 }
   0x4   :  { %s86_s1 = sshll.u32 %s129_s0, 4  ;;  %vm79_vm3 = vcmask 57344   ;;  %s87_s1 = int_to_ptr.vmem [resolvable:$true] %s86_s1 }
   0x5   :  { %v30_v4 = vpack.c.b16 %v28_v2, %v28_v2  ;;  %v31_v5 = vpack.c.b16 %v29_v3, %v29_v3 }
   0x7   :  { %41 = vmatpush.bf16.xpose.msra.mxu0 %v30_v4  ;;  %54 = vmatpush.bf16.xpose.msra.mxu1 %v31_v5 }
   0xa   :  { %v23_v6 = vld [vmem:[#allocation1] sm:$0xff]  ;;  %v24_v7 = vld [vmem:[#allocation1 + $0x9] sm:$0xff] }
   0xe   :  { %42 = vmatmul.bf16.vlgmr.msra.gmra.mxu0 %v23_v6  ;;  %55 = vmatmul.bf16.vlgmr.msra.gmra.mxu1 %v24_v7 }
  0x8b   :  { %v43_v9 = vpop.f32.mrf.mxu0  ;;  %v56_v10 = vpop.f32.mrf.mxu1 }
  0x8c   :  { %v44_v11 = vadd.f32 %v43_v9, %v20_v8 }
  0x8e   :  { %v57_v12 = vadd.f32 %v56_v10, %v44_v11 }
  0x90   :  { %v97_v13 = vmul.f32 -1.442695, %v57_v12 }
  0x92   :  { %99 = vpow2.f32 %v97_v13 }
  0x93   :  { %v45_v14 = vpop.f32.mrf.mxu0  ;;  %v58_v15 = vpop.f32.mrf.mxu1 }
  0x98   :  { %v100_v16 = vpop.eup %99 }
  0x99   :  { %v63_v17 = vadd.f32 1.0, %v100_v16 }
  0x9b   :  { %101 = vrcp.f32 %v63_v17  ;;  %v75_v21 = vand.u32 2147483648, %v63_v17  ;;  %v73_v23 = vand.u32 2147483647, %v63_v17  ;;  %vm69_vm1 = vweird.f32 %v63_v17 }
  0x9d   :  { %v76_v25 = vor.u32 1.1754944e-38, %v75_v21  ;;  %vm74_vm4 = vcmp.eq.f32.partialorder %v73_v23, 8.507059e+37 }
  0xa1   :  { %v102_v18 = vpop.eup %101 }
  0xa2   :  { %v65_v19 = vmul.f32 %v102_v18, %v63_v17  ;;  %vm70_vm0 = vweird.f32 %v102_v18 }
  0xa3   :  { %vm71_vm2 = vmor %vm69_vm1, %vm70_vm0 }
  0xa4   :  { %v66_v20 = vsub.f32 1.0, %v65_v19 }
  0xa6   :  { %v67_v22 = vmul.f32 %v102_v18, %v66_v20 }
  0xa8   :  { %v68_v24 = vadd.f32 %v102_v18, %v67_v22 }
  0xaa   :  { %v72_v26 = vsel %vm71_vm2, %v102_v18, %v68_v24 }
  0xab   :  { %v77_v27 = vsel %vm74_vm4, %v76_v25, %v72_v26 }
  0xac   :  { %80 = vst.msk [vmem:[#allocation3] sm:$0x1] %vm79_vm3, %v77_v27 }
  0xad   :  { %91 = dma.vmem_to_hbm [thread:$0]  %s87_s1, 16, %s89_s19, [#allocation4]  }
  0xae   :  { %127 = dma.done.wait [#allocation4], 16  }
  0xaf   :  { %128 = vsyncadd [#allocation4], 4294967280 }
  0xb0   :  { %96 = vsyncpa [#allocation4], 1 }

// kernel: siamese_forward.2
= control target key start
LH: loop header
LB: loop body
LE: loop exit
PB: predicated region body
PF: predicated region fallthrough
CT: control target
= control target key end

     0   :  { %vm553_vm0 = vcmask 1040384   ;;  %s1384_s2 = inlined_call_operand.vmem [shape: bf16[512,256], index: 2, kind: input, shape index: {}]   ;;  %s1385_s0 = inlined_call_operand.vmem [shape: f32[8,512], index: 0, kind: input, shape index: {}]   ;;  %s1386_s1 = inlined_call_operand.vmem [shape: f32[8,512], index: 1, kind: input, shape index: {}]   ;;  %s1387_s3 = inlined_call_operand.vmem [shape: f32[1,256], index: 3, kind: input, shape index: {}]   ;;  %s1388_s4 = inlined_call_operand.vmem [shape: bf16[8,256], index: 4, kind: output, shape index: {0}]   ;;  %s1389_s5 = inlined_call_operand.vmem [shape: f32[1,1,256], index: 5, kind: output, shape index: {1}]   ;;  %s1390_s6 = inlined_call_operand.vmem [shape: f32[1,1,256], index: 6, kind: output, shape index: {2}]  }
   0x1   :  { %v651_v0 = vld [vmem:[%s1384_s2 + $0x70] sm:$0xf]  ;;  %v864_v1 = vld [vmem:[%s1384_s2 + $0x74] sm:$0xf0]  ;;  %v643_v11 = vld [vmem:[%s1384_s2 + $0x60] sm:$0xf] }
   0x2   :  { %v715_v2 = vld [vmem:[%s1384_s2 + $0xf0] sm:$0xf]  ;;  %v652_v3 = vor.u32 %v864_v1, %v651_v0  ;;  %v880_v4 = vld [vmem:[%s1384_s2 + $0xf4] sm:$0xf0]  ;;  %v862_v13 = vld [vmem:[%s1384_s2 + $0x64] sm:$0xf0] }
   0x3   :  { %v779_v5 = vld [vmem:[%s1384_s2 + $0x170] sm:$0xf]  ;;  %v896_v6 = vld [vmem:[%s1384_s2 + $0x174] sm:$0xf0]  ;;  %v716_v7 = vor.u32 %v880_v4, %v715_v2  ;;  %v707_v14 = vld [vmem:[%s1384_s2 + $0xe0] sm:$0xf]  ;;  %v644_v16 = vor.u32 %v862_v13, %v643_v11 }
   0x4   :  { %v780_v8 = vor.u32 %v896_v6, %v779_v5  ;;  %v843_v9 = vld [vmem:[%s1384_s2 + $0x1f0] sm:$0xf]  ;;  %v912_v10 = vld [vmem:[%s1384_s2 + $0x1f4] sm:$0xf0]  ;;  %430 = vmatpush.bf16.msra.mxu0 %v652_v3  ;;  %v878_v15 = vld [vmem:[%s1384_s2 + $0xe4] sm:$0xf0] }
   0x5   :  { %v844_v12 = vor.u32 %v912_v10, %v843_v9  ;;  %443 = vmatpush.bf16.msra.mxu1 %v716_v7  ;;  %v708_v17 = vor.u32 %v878_v15, %v707_v14  ;;  %v771_v18 = vld [vmem:[%s1384_s2 + $0x160] sm:$0xf]  ;;  %v894_v19 = vld [vmem:[%s1384_s2 + $0x164] sm:$0xf0]  ;;  %v635_v23 = vld [vmem:[%s1384_s2 + $0x50] sm:$0xf] }
   0x6   :  { %456 = vmatpush.bf16.msra.mxu2 %v780_v8  ;;  %v835_v20 = vld [vmem:[%s1384_s2 + $0x1e0] sm:$0xf]  ;;  %v772_v21 = vor.u32 %v894_v19, %v771_v18  ;;  %v910_v22 = vld [vmem:[%s1384_s2 + $0x1e4] sm:$0xf0]  ;;  %v860_v24 = vld [vmem:[%s1384_s2 + $0x54] sm:$0xf0] }
   0x7   :  { %469 = vmatpush.bf16.msra.mxu3 %v844_v12  ;;  %v836_v25 = vor.u32 %v910_v22, %v835_v20  ;;  %v699_v26 = vld [vmem:[%s1384_s2 + $0xd0] sm:$0xf]  ;;  %v876_v27 = vld [vmem:[%s1384_s2 + $0xd4] sm:$0xf0]  ;;  %v636_v29 = vor.u32 %v860_v24, %v635_v23  ;;  %v627_v35 = vld [vmem:[%s1384_s2 + $0x40] sm:$0xf] }
   0x8   :  { %v763_v28 = vld [vmem:[%s1384_s2 + $0x150] sm:$0xf]  ;;  %431 = vmatpush.bf16.msra.mxu0 %v644_v16  ;;  %v892_v30 = vld [vmem:[%s1384_s2 + $0x154] sm:$0xf0]  ;;  %v700_v33 = vor.u32 %v876_v27, %v699_v26  ;;  %v858_v36 = vld [vmem:[%s1384_s2 + $0x44] sm:$0xf0] }
   0x9   :  { %v827_v31 = vld [vmem:[%s1384_s2 + $0x1d0] sm:$0xf]  ;;  %v908_v32 = vld [vmem:[%s1384_s2 + $0x1d4] sm:$0xf0]  ;;  %444 = vmatpush.bf16.msra.mxu1 %v708_v17  ;;  %v764_v34 = vor.u32 %v892_v30, %v763_v28  ;;  %v691_v37 = vld [vmem:[%s1384_s2 + $0xc0] sm:$0xf]  ;;  %v628_v44 = vor.u32 %v858_v36, %v627_v35 }
   0xa   :  { %457 = vmatpush.bf16.msra.mxu2 %v772_v21  ;;  %v828_v38 = vor.u32 %v908_v32, %v827_v31  ;;  %v874_v39 = vld [vmem:[%s1384_s2 + $0xc4] sm:$0xf0]  ;;  %v755_v40 = vld [vmem:[%s1384_s2 + $0x140] sm:$0xf]  ;;  %v619_v47 = vld [vmem:[%s1384_s2 + $0x30] sm:$0xf] }
   0xb   :  { %470 = vmatpush.bf16.msra.mxu3 %v836_v25  ;;  %v890_v41 = vld [vmem:[%s1384_s2 + $0x144] sm:$0xf0]  ;;  %v819_v42 = vld [vmem:[%s1384_s2 + $0x1c0] sm:$0xf]  ;;  %v692_v45 = vor.u32 %v874_v39, %v691_v37  ;;  %v856_v48 = vld [vmem:[%s1384_s2 + $0x34] sm:$0xf0] }
   0xc   :  { %v906_v43 = vld [vmem:[%s1384_s2 + $0x1c4] sm:$0xf0]  ;;  %432 = vmatpush.bf16.msra.mxu0 %v636_v29  ;;  %v756_v46 = vor.u32 %v890_v41, %v755_v40  ;;  %v683_v49 = vld [vmem:[%s1384_s2 + $0xb0] sm:$0xf]  ;;  %v872_v51 = vld [vmem:[%s1384_s2 + $0xb4] sm:$0xf0]  ;;  %v620_v56 = vor.u32 %v856_v48, %v619_v47 }
   0xd   :  { %445 = vmatpush.bf16.msra.mxu1 %v700_v33  ;;  %v820_v50 = vor.u32 %v906_v43, %v819_v42  ;;  %v747_v52 = vld [vmem:[%s1384_s2 + $0x130] sm:$0xf]  ;;  %v888_v53 = vld [vmem:[%s1384_s2 + $0x134] sm:$0xf0]  ;;  %v684_v57 = vor.u32 %v872_v51, %v683_v49  ;;  %v611_v59 = vld [vmem:[%s1384_s2 + $0x20] sm:$0xf] }
   0xe   :  { %458 = vmatpush.bf16.msra.mxu2 %v764_v34  ;;  %v811_v54 = vld [vmem:[%s1384_s2 + $0x1b0] sm:$0xf]  ;;  %v904_v55 = vld [vmem:[%s1384_s2 + $0x1b4] sm:$0xf0]  ;;  %v748_v58 = vor.u32 %v888_v53, %v747_v52  ;;  %v854_v60 = vld [vmem:[%s1384_s2 + $0x24] sm:$0xf0] }
   0xf   :  { %471 = vmatpush.bf16.msra.mxu3 %v828_v38  ;;  %v675_v61 = vld [vmem:[%s1384_s2 + $0xa0] sm:$0xf]  ;;  %v812_v62 = vor.u32 %v904_v55, %v811_v54  ;;  %v870_v63 = vld [vmem:[%s1384_s2 + $0xa4] sm:$0xf0]  ;;  %v612_v4 = vor.u32 %v854_v60, %v611_v59  ;;  %v603_v5 = vld [vmem:[%s1384_s2 + $0x10] sm:$0xf] }
  0x10   :  { %433 = vmatpush.bf16.msra.mxu0 %v628_v44  ;;  %v739_v0 = vld [vmem:[%s1384_s2 + $0x120] sm:$0xf]  ;;  %v886_v1 = vld [vmem:[%s1384_s2 + $0x124] sm:$0xf0]  ;;  %v676_v6 = vor.u32 %v870_v63, %v675_v61  ;;  %v852_v8 = vld [vmem:[%s1384_s2 + $0x14] sm:$0xf0] }
  0x11   :  { %446 = vmatpush.bf16.msra.mxu1 %v692_v45  ;;  %v803_v2 = vld [vmem:[%s1384_s2 + $0x1a0] sm:$0xf]  ;;  %v902_v3 = vld [vmem:[%s1384_s2 + $0x1a4] sm:$0xf0]  ;;  %v740_v7 = vor.u32 %v886_v1, %v739_v0  ;;  %v667_v9 = vld [vmem:[%s1384_s2 + $0x90] sm:$0xf]  ;;  %v604_v18 = vor.u32 %v852_v8, %v603_v5 }
  0x12   :  { %459 = vmatpush.bf16.msra.mxu2 %v756_v46  ;;  %v868_v10 = vld [vmem:[%s1384_s2 + $0x94] sm:$0xf0]  ;;  %v804_v11 = vor.u32 %v902_v3, %v803_v2  ;;  %v731_v12 = vld [vmem:[%s1384_s2 + $0x110] sm:$0xf]  ;;  %v595_v16 = vld [vmem:[%s1384_s2] sm:$0xf] }
  0x13   :  { %472 = vmatpush.bf16.msra.mxu3 %v820_v50  ;;  %v884_v13 = vld [vmem:[%s1384_s2 + $0x114] sm:$0xf0]  ;;  %v795_v14 = vld [vmem:[%s1384_s2 + $0x190] sm:$0xf]  ;;  %v850_v17 = vld [vmem:[%s1384_s2 + $0x4] sm:$0xf0]  ;;  %v668_v22 = vor.u32 %v868_v10, %v667_v9 }
  0x14   :  { %434 = vmatpush.bf16.msra.mxu0 %v620_v56  ;;  %v900_v15 = vld [vmem:[%s1384_s2 + $0x194] sm:$0xf0]  ;;  %v659_v19 = vld [vmem:[%s1384_s2 + $0x80] sm:$0xf]  ;;  %v866_v20 = vld [vmem:[%s1384_s2 + $0x84] sm:$0xf0]  ;;  %v732_v23 = vor.u32 %v884_v13, %v731_v12  ;;  %v596_v34 = vor.u32 %v850_v17, %v595_v16 }
  0x15   :  { %447 = vmatpush.bf16.msra.mxu1 %v684_v57  ;;  %v723_v21 = vld [vmem:[%s1384_s2 + $0x100] sm:$0xf]  ;;  %v882_v24 = vld [vmem:[%s1384_s2 + $0x104] sm:$0xf0]  ;;  %v796_v27 = vor.u32 %v900_v15, %v795_v14  ;;  %v863_v28 = vld [vmem:[%s1384_s2 + $0x74] sm:$0xf]  ;;  %v660_v38 = vor.u32 %v866_v20, %v659_v19 }
  0x16   :  { %460 = vmatpush.bf16.msra.mxu2 %v748_v58  ;;  %v787_v25 = vld [vmem:[%s1384_s2 + $0x180] sm:$0xf]  ;;  %v898_v26 = vld [vmem:[%s1384_s2 + $0x184] sm:$0xf0]  ;;  %v653_v29 = vld [vmem:[%s1384_s2 + $0x78] sm:$0xf0]  ;;  %v724_v39 = vor.u32 %v882_v24, %v723_v21 }
  0x17   :  { %473 = vmatpush.bf16.msra.mxu3 %v812_v62  ;;  %v879_v30 = vld [vmem:[%s1384_s2 + $0xf4] sm:$0xf]  ;;  %v717_v31 = vld [vmem:[%s1384_s2 + $0xf8] sm:$0xf0]  ;;  %v861_v41 = vld [vmem:[%s1384_s2 + $0x64] sm:$0xf]  ;;  %v788_v44 = vor.u32 %v898_v26, %v787_v25  ;;  %v656_v45 = vor.u32 %v863_v28, %v653_v29 }
  0x18   :  { %435 = vmatpush.bf16.msra.mxu0 %v612_v4  ;;  %v895_v32 = vld [vmem:[%s1384_s2 + $0x174] sm:$0xf]  ;;  %v781_v35 = vld [vmem:[%s1384_s2 + $0x178] sm:$0xf0]  ;;  %v645_v42 = vld [vmem:[%s1384_s2 + $0x68] sm:$0xf0]  ;;  %v720_v50 = vor.u32 %v879_v30, %v717_v31 }
  0x19   :  { %448 = vmatpush.bf16.msra.mxu1 %v676_v6  ;;  %v22_v33 = vld [vmem:[%s1385_s0 + $0x10] sm:$0xff]  ;;  %v845_v40 = vld [vmem:[%s1384_s2 + $0x1f8] sm:$0xf0]  ;;  %v877_v46 = vld [vmem:[%s1384_s2 + $0xe4] sm:$0xf]  ;;  %v784_v51 = vor.u32 %v895_v32, %v781_v35  ;;  %v648_v2 = vor.u32 %v861_v41, %v645_v42 }
  0x1a   :  { %461 = vmatpush.bf16.msra.mxu2 %v740_v7  ;;  %v911_v36 = vld [vmem:[%s1384_s2 + $0x1f4] sm:$0xf]  ;;  %v709_v47 = vld [vmem:[%s1384_s2 + $0xe8] sm:$0xf0]  ;;  %v893_v48 = vld [vmem:[%s1384_s2 + $0x164] sm:$0xf] }
  0x1b   :  { %474 = vmatpush.bf16.msra.mxu3 %v804_v11  ;;  %v26_v37 = vld [vmem:[%s1386_s1 + $0x10] sm:$0xff]  ;;  %v773_v49 = vld [vmem:[%s1384_s2 + $0x168] sm:$0xf0]  ;;  %v20_v53 = vld [vmem:[%s1385_s0] sm:$0xff]  ;;  %v848_v56 = vor.u32 %v911_v36, %v845_v40  ;;  %v712_v6 = vor.u32 %v877_v46, %v709_v47 }
  0x1c   :  { %436 = vmatpush.bf16.msra.mxu0 %v604_v18  ;;  %v30_v43 = vsub.f32 %v22_v33, %v26_v37  ;;  %v24_v54 = vld [vmem:[%s1386_s1] sm:$0xff]  ;;  %v23_v55 = vld [vmem:[%s1385_s0 + $0x18] sm:$0xff]  ;;  %v21_v59 = vld [vmem:[%s1385_s0 + $0x8] sm:$0xff]  ;;  %v776_v7 = vor.u32 %v893_v48, %v773_v49 }
  0x1d   :  { %449 = vmatpush.bf16.msra.mxu1 %v668_v22  ;;  %v28_v57 = vsub.f32 %v20_v53, %v24_v54  ;;  %v27_v58 = vld [vmem:[%s1386_s1 + $0x18] sm:$0xff]  ;;  %v25_v60 = vld [vmem:[%s1386_s1 + $0x8] sm:$0xff]  ;;  %v909_v61 = vld [vmem:[%s1384_s2 + $0x1e4] sm:$0xf] }
  0x1e   :  { %462 = vmatpush.bf16.msra.mxu2 %v732_v23  ;;  %v34_v52 = vand.u32 2147483647, %v30_v43  ;;  %v837_v62 = vld [vmem:[%s1384_s2 + $0x1e8] sm:$0xf0]  ;;  %v31_v0 = vsub.f32 %v23_v55, %v27_v58  ;;  %v29_v1 = vsub.f32 %v21_v59, %v25_v60  ;;  %v859_v3 = vld [vmem:[%s1384_s2 + $0x54] sm:$0xf] }
  0x1f   :  { %475 = vmatpush.bf16.msra.mxu3 %v796_v27  ;;  %v637_v4 = vld [vmem:[%s1384_s2 + $0x58] sm:$0xf0]  ;;  %v32_v5 = vand.u32 2147483647, %v28_v57  ;;  %v875_v8 = vld [vmem:[%s1384_s2 + $0xd4] sm:$0xf]  ;;  %v840_v11 = vor.u32 %v909_v61, %v837_v62 }
  0x20   :  { %437 = vmatpush.bf16.msra.mxu0 %v596_v34  ;;  %v1212_v63 = vpack.c.bf16 %v34_v52, %v34_v52  ;;  %v35_v9 = vand.u32 2147483647, %v31_v0  ;;  %v33_v10 = vand.u32 2147483647, %v29_v1  ;;  %v701_v12 = vld [vmem:[%s1384_s2 + $0xd8] sm:$0xf0]  ;;  %v640_v20 = vor.u32 %v859_v3, %v637_v4 }
  0x21   :  { %450 = vmatpush.bf16.msra.mxu1 %v660_v38  ;;  %v891_v13 = vld [vmem:[%s1384_s2 + $0x154] sm:$0xf]  ;;  %v765_v14 = vld [vmem:[%s1384_s2 + $0x158] sm:$0xf0]  ;;  %v1233_v15 = vpack.c.bf16 %v32_v5, %v32_v5  ;;  %v704_v21 = vor.u32 %v875_v8, %v701_v12  ;;  %v857_v23 = vld [vmem:[%s1384_s2 + $0x44] sm:$0xf] }
  0x22   :  { %463 = vmatpush.bf16.msra.mxu2 %v724_v39  ;;  %v907_v16 = vld [vmem:[%s1384_s2 + $0x1d4] sm:$0xf]  ;;  %v829_v17 = vld [vmem:[%s1384_s2 + $0x1d8] sm:$0xf0]  ;;  %v1241_v18 = vpack.c.bf16 %v35_v9, %v35_v9  ;;  %v1243_v19 = vpack.c.bf16 %v33_v10, %v33_v10  ;;  %v768_v22 = vor.u32 %v891_v13, %v765_v14  ;;  %v629_v24 = vld [vmem:[%s1384_s2 + $0x48] sm:$0xf0] }
  0x23   :  { %476 = vmatpush.bf16.msra.mxu3 %v788_v44  ;;  %v873_v25 = vld [vmem:[%s1384_s2 + $0xc4] sm:$0xf]  ;;  %v832_v26 = vor.u32 %v907_v16, %v829_v17  ;;  %438 = vmatmul.bf16.vlgmr.msra.gmra.mxu0 %v1233_v15  ;;  %v693_v27 = vld [vmem:[%s1384_s2 + $0xc8] sm:$0xf0]  ;;  %v632_v32 = vor.u32 %v857_v23, %v629_v24  ;;  %v855_v35 = vld [vmem:[%s1384_s2 + $0x34] sm:$0xf] }
  0x24   :  { %482 = vmatpush.bf16.msrb.mxu0 %v656_v45  ;;  %v889_v28 = vld [vmem:[%s1384_s2 + $0x144] sm:$0xf]  ;;  %v757_v29 = vld [vmem:[%s1384_s2 + $0x148] sm:$0xf0]  ;;  %451 = vmatmul.bf16.vlgmr.msra.gmra.mxu1 %v1243_v19  ;;  %v696_v33 = vor.u32 %v873_v25, %v693_v27  ;;  %v621_v36 = vld [vmem:[%s1384_s2 + $0x38] sm:$0xf0] }
  0x25   :  { %495 = vmatpush.bf16.msrb.mxu1 %v720_v50  ;;  %464 = vmatmul.bf16.vlgmr.msra.gmra.mxu2 %v1212_v63  ;;  %v905_v30 = vld [vmem:[%s1384_s2 + $0x1c4] sm:$0xf]  ;;  %v821_v31 = vld [vmem:[%s1384_s2 + $0x1c8] sm:$0xf0]  ;;  %v760_v34 = vor.u32 %v889_v28, %v757_v29  ;;  %v871_v37 = vld [vmem:[%s1384_s2 + $0xb4] sm:$0xf]  ;;  %v624_v44 = vor.u32 %v855_v35, %v621_v36 }
  0x26   :  { %508 = vmatpush.bf16.msrb.mxu2 %v784_v51  ;;  %477 = vmatmul.bf16.vlgmr.msra.gmra.mxu3 %v1241_v18  ;;  %v824_v38 = vor.u32 %v905_v30, %v821_v31  ;;  %v685_v39 = vld [vmem:[%s1384_s2 + $0xb8] sm:$0xf0]  ;;  %v887_v40 = vld [vmem:[%s1384_s2 + $0x134] sm:$0xf]  ;;  %v853_v47 = vld [vmem:[%s1384_s2 + $0x24] sm:$0xf] }
  0x27   :  { %521 = vmatpush.bf16.msrb.mxu3 %v848_v56  ;;  %v749_v41 = vld [vmem:[%s1384_s2 + $0x138] sm:$0xf0]  ;;  %v903_v42 = vld [vmem:[%s1384_s2 + $0x1b4] sm:$0xf]  ;;  %v688_v45 = vor.u32 %v871_v37, %v685_v39  ;;  %v613_v48 = vld [vmem:[%s1384_s2 + $0x28] sm:$0xf0] }
  0x28   :  { %483 = vmatpush.bf16.msrb.mxu0 %v648_v2  ;;  %v813_v43 = vld [vmem:[%s1384_s2 + $0x1b8] sm:$0xf0]  ;;  %v752_v46 = vor.u32 %v887_v40, %v749_v41  ;;  %v869_v49 = vld [vmem:[%s1384_s2 + $0xa4] sm:$0xf]  ;;  %v677_v51 = vld [vmem:[%s1384_s2 + $0xa8] sm:$0xf0]  ;;  %v616_v56 = vor.u32 %v853_v47, %v613_v48 }
  0x29   :  { %496 = vmatpush.bf16.msrb.mxu1 %v712_v6  ;;  %v816_v50 = vor.u32 %v903_v42, %v813_v43  ;;  %v885_v52 = vld [vmem:[%s1384_s2 + $0x124] sm:$0xf]  ;;  %v741_v53 = vld [vmem:[%s1384_s2 + $0x128] sm:$0xf0]  ;;  %v680_v57 = vor.u32 %v869_v49, %v677_v51  ;;  %v851_v59 = vld [vmem:[%s1384_s2 + $0x14] sm:$0xf] }
  0x2a   :  { %509 = vmatpush.bf16.msrb.mxu2 %v776_v7  ;;  %v901_v54 = vld [vmem:[%s1384_s2 + $0x1a4] sm:$0xf]  ;;  %v805_v55 = vld [vmem:[%s1384_s2 + $0x1a8] sm:$0xf0]  ;;  %v744_v58 = vor.u32 %v885_v52, %v741_v53  ;;  %v605_v60 = vld [vmem:[%s1384_s2 + $0x18] sm:$0xf0] }
  0x2b   :  { %522 = vmatpush.bf16.msrb.mxu3 %v840_v11  ;;  %v867_v61 = vld [vmem:[%s1384_s2 + $0x94] sm:$0xf]  ;;  %v808_v62 = vor.u32 %v901_v54, %v805_v55  ;;  %v669_v0 = vld [vmem:[%s1384_s2 + $0x98] sm:$0xf0]  ;;  %v608_v5 = vor.u32 %v851_v59, %v605_v60  ;;  %v849_v8 = vld [vmem:[%s1384_s2 + $0x4] sm:$0xf] }
  0x2c   :  { %484 = vmatpush.bf16.msrb.mxu0 %v640_v20  ;;  %v883_v1 = vld [vmem:[%s1384_s2 + $0x114] sm:$0xf]  ;;  %v733_v2 = vld [vmem:[%s1384_s2 + $0x118] sm:$0xf0]  ;;  %v672_v6 = vor.u32 %v867_v61, %v669_v0  ;;  %v597_v9 = vld [vmem:[%s1384_s2 + $0x8] sm:$0xf0] }
  0x2d   :  { %497 = vmatpush.bf16.msrb.mxu1 %v704_v21  ;;  %v899_v3 = vld [vmem:[%s1384_s2 + $0x194] sm:$0xf]  ;;  %v797_v4 = vld [vmem:[%s1384_s2 + $0x198] sm:$0xf0]  ;;  %v736_v7 = vor.u32 %v883_v1, %v733_v2  ;;  %v865_v10 = vld [vmem:[%s1384_s2 + $0x84] sm:$0xf]  ;;  %v600_v20 = vor.u32 %v849_v8, %v597_v9 }
  0x2e   :  { %510 = vmatpush.bf16.msrb.mxu2 %v768_v22  ;;  %v800_v11 = vor.u32 %v899_v3, %v797_v4  ;;  %v661_v12 = vld [vmem:[%s1384_s2 + $0x88] sm:$0xf0]  ;;  %v881_v13 = vld [vmem:[%s1384_s2 + $0x104] sm:$0xf] }
  0x2f   :  { %523 = vmatpush.bf16.msrb.mxu3 %v832_v26  ;;  %v725_v14 = vld [vmem:[%s1384_s2 + $0x108] sm:$0xf0]  ;;  %v897_v16 = vld [vmem:[%s1384_s2 + $0x184] sm:$0xf]  ;;  %v664_v21 = vor.u32 %v865_v10, %v661_v12  ;;  %v104_v26 = vld [vmem:[%s1387_s3] sm:$0x3] }
  0x30   :  { %485 = vmatpush.bf16.msrb.mxu0 %v632_v32  ;;  %v789_v17 = vld [vmem:[%s1384_s2 + $0x188] sm:$0xf0]  ;;  %v728_v22 = vor.u32 %v881_v13, %v725_v14  ;;  %v106_v28 = vperm.slane %v104_v26, 0 }
  0x31   :  { %498 = vmatpush.bf16.msrb.mxu1 %v696_v33  ;;  %v792_v23 = vor.u32 %v897_v16, %v789_v17 }
  0x32   :  { %511 = vmatpush.bf16.msrb.mxu2 %v760_v34 }
  0x33   :  { %524 = vmatpush.bf16.msrb.mxu3 %v824_v38 }
  0x34   :  { %486 = vmatpush.bf16.msrb.mxu0 %v624_v44 }
  0x35   :  { %499 = vmatpush.bf16.msrb.mxu1 %v688_v45 }
  0x36   :  { %512 = vmatpush.bf16.msrb.mxu2 %v752_v46 }
  0x37   :  { %525 = vmatpush.bf16.msrb.mxu3 %v816_v50 }
  0x38   :  { %487 = vmatpush.bf16.msrb.mxu0 %v616_v56 }
  0x39   :  { %500 = vmatpush.bf16.msrb.mxu1 %v680_v57 }
  0x3a   :  { %513 = vmatpush.bf16.msrb.mxu2 %v744_v58 }
  0x3b   :  { %526 = vmatpush.bf16.msrb.mxu3 %v808_v62 }
  0x3c   :  { %488 = vmatpush.bf16.msrb.mxu0 %v608_v5 }
  0x3d   :  { %501 = vmatpush.bf16.msrb.mxu1 %v672_v6  ;;  %v556_v6 = vlaneseq }
  0x3e   :  { %514 = vmatpush.bf16.msrb.mxu2 %v736_v7 }
  0x3f   :  { %527 = vmatpush.bf16.msrb.mxu3 %v800_v11  ;;  %vm558_vm1 = vcmp.lt.s32.totalorder %v556_v6, 256 }
  0x40   :  { %489 = vmatpush.bf16.msrb.mxu0 %v600_v20 }
  0x41   :  { %502 = vmatpush.bf16.msrb.mxu1 %v664_v21 }
  0x42   :  { %515 = vmatpush.bf16.msrb.mxu2 %v728_v22 }
  0x43   :  { %528 = vmatpush.bf16.msrb.mxu3 %v792_v23  ;;  %490 = vmatmul.bf16.vlgmr.msrb.gmra.mxu0 %v1233_v15 }
  0x44   :  { %503 = vmatmul.bf16.vlgmr.msrb.gmra.mxu1 %v1243_v19 }
  0x45   :  { %516 = vmatmul.bf16.vlgmr.msrb.gmra.mxu2 %v1212_v63  ;;  %v107_v63 = vperm.slane %v104_v26, 1 }
  0x46   :  { %529 = vmatmul.bf16.vlgmr.msrb.gmra.mxu3 %v1241_v18 }
  0xa0   :  { %v439_v24 = vpop.f32.mrf.mxu0 }
  0xa1   :  { %v452_v25 = vpop.f32.mrf.mxu1  ;;  %v440_v31 = vadd.f32 %v439_v24, %v106_v28 }
  0xa3   :  { %v453_v15 = vadd.f32 %v452_v25, %v440_v31 }
  0xa8   :  { %v465_v27 = vpop.f32.mrf.mxu2  ;;  %v441_v30 = vpop.f32.mrf.mxu0 }
  0xa9   :  { %v478_v29 = vpop.f32.mrf.mxu3  ;;  %v454_v32 = vpop.f32.mrf.mxu1  ;;  %v466_v19 = vadd.f32 %v465_v27, %v453_v15 }
  0xab   :  { %v479_v35 = vadd.f32 %v478_v29, %v466_v19 }
  0xad   :  { %v534_v36 = vmax.f32 %v479_v35, 0.0 }
  0xaf   :  { %v561_v39 = vmul.f32 %v534_v36, %v534_v36  ;;  %v538_v41 = vrot.slane %v534_v36, 4 }
  0xb0   :  { %v467_v33 = vpop.f32.mrf.mxu2 }
  0xb1   :  { %v480_v34 = vpop.f32.mrf.mxu3  ;;  %v563_v43 = vrot.slane %v561_v39, 4  ;;  %v539_v48 = vadd.f32 %v538_v41, %v534_v36 }
  0xb3   :  { %v564_v50 = vadd.f32 %v563_v43, %v561_v39  ;;  %v540_v52 = vrot.slane %v539_v48, 2 }
  0xb5   :  { %v565_v57 = vrot.slane %v564_v50, 2  ;;  %v541_v61 = vadd.f32 %v540_v52, %v539_v48 }
  0xb7   :  { %v566_v1 = vadd.f32 %v565_v57, %v564_v50  ;;  %v542_v4 = vrot.slane %v541_v61, 1 }
  0xb9   :  { %v567_v8 = vrot.slane %v566_v1, 1  ;;  %v543_v11 = vadd.f32 %v542_v4, %v541_v61 }
  0xbb   :  { %v568_v14 = vadd.f32 %v567_v8, %v566_v1 }
  0xc0   :  { %v491_v18 = vpop.f32.mrf.mxu0 }
  0xc1   :  { %v492_v37 = vadd.f32 %v491_v18, %v107_v63  ;;  %v504_v38 = vpop.f32.mrf.mxu1 }
  0xc3   :  { %v505_v40 = vadd.f32 %v504_v38, %v492_v37 }
  0xc8   :  { %v517_v42 = vpop.f32.mrf.mxu2  ;;  %v493_v46 = vpop.f32.mrf.mxu0 }
  0xc9   :  { %v518_v44 = vadd.f32 %v517_v42, %v505_v40  ;;  %v530_v45 = vpop.f32.mrf.mxu3  ;;  %v506_v47 = vpop.f32.mrf.mxu1 }
  0xcb   :  { %v531_v49 = vadd.f32 %v530_v45, %v518_v44 }
  0xcd   :  { %v535_v51 = vmax.f32 %v531_v49, 0.0 }
  0xcf   :  { %v536_v53 = vpack.c.bf16 %v535_v51, %v534_v36  ;;  %v544_v54 = vrot.slane %v535_v51, 4  ;;  %v562_v55 = vmul.f32 %v535_v51, %v535_v51 }
  0xd0   :  { %v519_v56 = vpop.f32.mrf.mxu2 }
  0xd1   :  { %537 = vst [vmem:[%s1388_s4] sm:$0xff] %v536_v53  ;;  %v545_v58 = vadd.f32 %v544_v54, %v535_v51  ;;  %v569_v59 = vrot.slane %v562_v55, 4  ;;  %v532_v60 = vpop.f32.mrf.mxu3 }
  0xd3   :  { %v546_v62 = vrot.slane %v545_v58, 2  ;;  %v570_v0 = vadd.f32 %v569_v59, %v562_v55 }
  0xd5   :  { %v547_v2 = vadd.f32 %v546_v62, %v545_v58  ;;  %v571_v3 = vrot.slane %v570_v0, 2 }
  0xd7   :  { %v548_v5 = vrot.slane %v547_v2, 1  ;;  %v572_v7 = vadd.f32 %v571_v3, %v570_v0 }
  0xd9   :  { %v549_v9 = vadd.f32 %v548_v5, %v547_v2  ;;  %v573_v10 = vrot.slane %v572_v7, 1 }
  0xdb   :  { %v552_v12 = vrot.slane %v549_v9, 7  ;;  %v574_v13 = vadd.f32 %v573_v10, %v572_v7 }
  0xdd   :  { %v554_v16 = vsel %vm553_vm0, %v543_v11, %v552_v12  ;;  %v577_v17 = vrot.slane %v574_v13, 7 }
  0xde   :  { %560 = vst.msk [vmem:[%s1389_s5] sm:$0x3] %vm558_vm1, %v554_v16 }
  0xdf   :  { %v578_v20 = vsel %vm553_vm0, %v568_v14, %v577_v17 }
  0xe0   :  { %580 = vst.msk [vmem:[%s1390_s6] sm:$0x3] %vm558_vm1, %v578_v20 }

</bundles_post_ra>
